<compile_context>
chip_gen: v7x
topology: tpu7x:2x2x1
jax: 0.10.0
libtpu: 0.0.40
codegen_flags: <defaults>
</compile_context>

<pallas_src>
import functools

import jax
import jax.numpy as jnp
from jax.experimental import pallas as pl
from jax.experimental.pallas import tpu as pltpu

EPS = 1e-16  # _l2norm eps:  x / (||x|| + eps)


def _ceil_to(x, n):
    return -(-x // n) * n


def _vmem_capacity_bytes():
    """Per-core VMEM capacity; conservative fallback if the query is unavailable."""
    try:
        info = pltpu.get_tpu_info()
        cap = getattr(info, "vmem_capacity_bytes", None)
        if cap:
            return int(cap)
    except Exception:
        pass
    return 64 * 1024 * 1024  # v7x per-TensorCore VMEM (smallest current part)


def _vmem_budgets():
    """(vmem_limit_bytes for CompilerParams, double-buffered block budget)."""
    cap = _vmem_capacity_bytes()
    # v7x (64 MiB): limit ~45 MiB, blocks ~25 MiB.  v5e/v6e (128 MiB): limit ~90 MiB, blocks ~49 MiB.
    vmem_limit = max(32 << 20, min(int(cap * 0.70), 96 << 20))
    block_budget = int(vmem_limit * 0.55)
    return vmem_limit, block_budget


def _pick_query_tile(q, hw, c, n_ways, m, in_itemsize, out_itemsize, block_budget):
    """Largest query tile whose padding-aware, double-buffered blocks fit the VMEM budget."""
    hw8 = _ceil_to(hw, 8)
    c8 = _ceil_to(c, 8)
    c128 = _ceil_to(c, 128)
    m128 = _ceil_to(m, 128)
    # support block is batch-resident but Pallas still double-buffers it
    sup_bytes = 2 * n_ways * c8 * m128 * in_itemsize
    # per-unit-of-tq cost: query block + output block, both double-buffered, padded
    per_tq = 2 * (hw8 * c128 * in_itemsize + n_ways * hw8 * m128 * out_itemsize)
    tq = max(1, min(q, (block_budget - sup_bytes) // per_tq))
    # even out the blocks (ragged last block allowed; grid uses cdiv)
    nqt = -(-q // tq)
    tq = -(-q // nqt)
    return int(tq), int(nqt)


def _innerproduct_kernel(q_ref, s_ref, o_ref, *, approx_norm):
    # q_ref: (1, tq, hw, c)           query block, channel-last
    # s_ref: (1, n_ways, c, m)        support block, PRE-NORMALIZED, VMEM-resident per batch
    # o_ref: (1, tq, n_ways, hw, m)   similarity output block
    c = s_ref.shape[2]
    m = s_ref.shape[3]
    tq = o_ref.shape[1]
    n_ways = o_ref.shape[2]
    hw = o_ref.shape[3]
    in_dt = q_ref.dtype

    # --- normalize the query block once over channels (f32 math) ---
    qv = q_ref[0].reshape(tq * hw, c).astype(jnp.float32)          # (TQ*HW, C)
    nrm = jnp.sqrt(jnp.sum(qv * qv, axis=-1, keepdims=True)) + EPS  # (TQ*HW, 1)
    if approx_norm:
        qn = (qv * pl.reciprocal(nrm, approx=True)).astype(in_dt)   # EUP path (free slot)
    else:
        qn = (qv / nrm).astype(in_dt)                                # exact fallback

    # --- one MXU matmul per way; support is already normalized ---
    for wi in range(n_ways):                                         # n_ways is small; static unroll
        sn = s_ref[0, wi]                                            # (C, M), input dtype
        r = jnp.dot(qn, sn, preferred_element_type=jnp.float32)      # (TQ*HW, M), f32 acc
        o_ref[0, :, wi, :, :] = r.reshape(tq, hw, m).astype(o_ref.dtype)


def innerproduct_similarity(support_xf, query_xf, n_ways, n_shots,
                            metric="cosine", approx_norm=True):
    assert metric == "cosine", "only cosine metric implemented"
    b, s_tot, c, h, w = support_xf.shape
    _, q, _, _, _ = query_xf.shape
    assert s_tot == n_ways * n_shots
    hw = h * w
    m = n_shots * hw

    in_dtype = jnp.result_type(support_xf.dtype, query_xf.dtype)
    out_dtype = in_dtype  # PyTorch: matmul of input-dtype operands returns the input dtype

    # support: (b, s, c, h, w) -> (b, n_ways, c, M), L2-normalized over channels ONCE (exact, XLA)
    sup = support_xf.reshape(b, n_ways, n_shots, c, hw)
    sup = jnp.transpose(sup, (0, 1, 3, 2, 4)).reshape(b, n_ways, c, m).astype(jnp.float32)
    sup = sup / (jnp.sqrt(jnp.sum(sup * sup, axis=2, keepdims=True)) + EPS)
    sup = sup.astype(in_dtype)

    # query: (b, q, c, h, w) -> channel-last (b, q, hw, c)
    qry = query_xf.reshape(b, q, c, hw)
    qry = jnp.transpose(qry, (0, 1, 3, 2)).astype(in_dtype)

    vmem_limit, block_budget = _vmem_budgets()
    in_isz = jnp.dtype(in_dtype).itemsize
    out_isz = jnp.dtype(out_dtype).itemsize
    tq, nqt = _pick_query_tile(q, hw, c, n_ways, m, in_isz, out_isz, block_budget)

    out = pl.pallas_call(
        functools.partial(_innerproduct_kernel, approx_norm=approx_norm),
        out_shape=jax.ShapeDtypeStruct((b, q, n_ways, hw, m), out_dtype),
        grid_spec=pltpu.PrefetchScalarGridSpec(
            num_scalar_prefetch=0,
            grid=(b, nqt),
            in_specs=[
                # query block: depends on (batch, query-tile); ragged last tile is masked
                pl.BlockSpec((1, tq, hw, c), lambda bi, qt: (bi, qt, 0, 0)),
                # support block: depends on batch only -> stays VMEM-resident across query tiles
                pl.BlockSpec((1, n_ways, c, m), lambda bi, qt: (bi, 0, 0, 0)),
            ],
            out_specs=pl.BlockSpec(
                (1, tq, n_ways, hw, m), lambda bi, qt: (bi, qt, 0, 0, 0)
            ),
        ),
        compiler_params=pltpu.CompilerParams(
            dimension_semantics=("parallel", "parallel"),
            vmem_limit_bytes=int(vmem_limit),
        ),
    )(qry, sup)
    return out


def _reference(support_xf, query_xf, n_ways, n_shots):
    # pure-JAX transliteration of the PyTorch forward (cosine)
    b, s_tot, c, h, w = support_xf.shape
    _, q, _, _, _ = query_xf.shape
    sup = support_xf.reshape(b, n_ways, n_shots, c, h, w)
    sup = jnp.transpose(sup, (0, 1, 3, 2, 4, 5)).reshape(b, n_ways, c, -1)
    qry = query_xf.reshape(b, q, c, h * w)
    sup = sup[:, None]            # (b, 1, n_ways, c, M)
    qry = qry[:, :, None]         # (b, q, 1, c, hw)
    sup = sup / (jnp.linalg.norm(sup, axis=-2, keepdims=True) + EPS)
    qry = qry / (jnp.linalg.norm(qry, axis=-2, keepdims=True) + EPS)
    qry = jnp.swapaxes(qry, 3, 4)  # (b, q, n_ways, hw, c)
    return qry @ sup               # (b, q, n_ways, hw, M)


if __name__ == "__main__":
    # small episode: 2-way 2-shot, 3 queries, c=32 channels, 4x4 feature map
    b, n_ways, n_shots, q, c, h, w = 2, 2, 2, 3, 32, 4, 4
    s_tot = n_ways * n_shots

    key = jax.random.PRNGKey(0)
    k1, k2 = jax.random.split(key)
    support_xf = jax.random.normal(k1, (b, s_tot, c, h, w), dtype=jnp.float32)
    query_xf = jax.random.normal(k2, (b, q, c, h, w), dtype=jnp.float32)

    simi = innerproduct_similarity(support_xf, query_xf, n_ways, n_shots)
    simi = jax.block_until_ready(simi)

    ref = _reference(support_xf, query_xf, n_ways, n_shots)
    assert simi.shape == (b, q, n_ways, h * w, n_shots * h * w), simi.shape
    assert simi.dtype == query_xf.dtype, simi.dtype
    # tolerance accommodates the approximate EUP reciprocal used for the query normalization
    # (support normalization is exact in the wrapper); structural bugs would be O(1) mismatches.
    assert jnp.allclose(simi, ref, rtol=1e-2, atol=1e-2), "mismatch vs reference"

    print("KERNEL_OK")
</pallas_src>

<mosaic_0001>
module attributes {stable_mosaic.version = 11 : i64} {
  func.func @_innerproduct_kernel(%arg0: i32, %arg1: i32, %arg2: memref<1x3x16x32xf32, #tpu.memory_space<vmem>>, %arg3: memref<1x2x32x32xf32, #tpu.memory_space<vmem>>, %arg4: memref<1x3x2x16x32xf32, #tpu.memory_space<vmem>>) attributes {dimension_semantics = [#tpu.dimension_semantics<parallel>, #tpu.dimension_semantics<parallel>], iteration_bounds = array<i64: 2, 1>, scalar_prefetch = 0 : i64, scratch_operands = 0 : i64, tpu.core_type = #tpu.core_type<tc>, window_params = [{transform_indices = @transform_0, window_bounds = array<i64: 1, 3, 16, 32>}, {transform_indices = @transform_1, window_bounds = array<i64: 1, 2, 32, 32>}, {transform_indices = @transform_2, window_bounds = array<i64: 1, 3, 2, 16, 32>}]} {
    %c0 = arith.constant 0 : index
    %c0_0 = arith.constant 0 : index
    %c0_1 = arith.constant 0 : index
    %c0_2 = arith.constant 0 : index
    %0 = vector.load %arg2[%c0, %c0_0, %c0_1, %c0_2] : memref<1x3x16x32xf32, #tpu.memory_space<vmem>>, vector<1x3x16x32xf32>
    %1 = vector.shape_cast %0 : vector<1x3x16x32xf32> to vector<3x16x32xf32>
    %2 = vector.shape_cast %1 : vector<3x16x32xf32> to vector<48x32xf32>
    %3 = arith.mulf %2, %2 : vector<48x32xf32>
    %cst = arith.constant dense<0.000000e+00> : vector<48xf32>
    %4 = vector.multi_reduction <add>, %3, %cst [1] : vector<48x32xf32> to vector<48xf32>
    %5 = vector.shape_cast %4 : vector<48xf32> to vector<48x1xf32>
    %6 = math.sqrt %5 : vector<48x1xf32>
    %cst_3 = arith.constant 1.000000e-16 : f32
    %7 = vector.broadcast %cst_3 : f32 to vector<48x1xf32>
    %8 = arith.addf %6, %7 : vector<48x1xf32>
    %9 = tpu.reciprocal %8 {approx = true} : vector<48x1xf32> -> vector<48x1xf32>
    %10 = vector.broadcast %9 : vector<48x1xf32> to vector<48x32xf32>
    %11 = arith.mulf %2, %10 : vector<48x32xf32>
    %c0_4 = arith.constant 0 : index
    %c0_5 = arith.constant 0 : index
    %c0_6 = arith.constant 0 : index
    %c0_7 = arith.constant 0 : index
    %12 = vector.load %arg3[%c0_4, %c0_5, %c0_6, %c0_7] : memref<1x2x32x32xf32, #tpu.memory_space<vmem>>, vector<1x1x32x32xf32>
    %13 = vector.shape_cast %12 : vector<1x1x32x32xf32> to vector<32x32xf32>
    %cst_8 = arith.constant dense<0.000000e+00> : vector<48x32xf32>
    %14 = tpu.matmul %11, %13, %cst_8 {dimension_numbers = #tpu.dot_dimension_numbers<[1], [0], [0], [1], [0, 0, 1, 1], [], []>} : vector<48x32xf32>, vector<32x32xf32>, vector<48x32xf32> -> vector<48x32xf32>
    %15 = vector.shape_cast %14 : vector<48x32xf32> to vector<3x16x32xf32>
    %c0_9 = arith.constant 0 : index
    %c0_10 = arith.constant 0 : index
    %c0_11 = arith.constant 0 : index
    %c0_12 = arith.constant 0 : index
    %c0_13 = arith.constant 0 : index
    %16 = vector.load %arg4[%c0_9, %c0_10, %c0_11, %c0_12, %c0_13] : memref<1x3x2x16x32xf32, #tpu.memory_space<vmem>>, vector<1x3x1x16x32xf32>
    %17 = vector.shape_cast %16 : vector<1x3x1x16x32xf32> to vector<3x16x32xf32>
    %18 = vector.shape_cast %15 : vector<3x16x32xf32> to vector<1x3x1x16x32xf32>
    tpu.vector_store %arg4[%c0_9, %c0_10, %c0_11, %c0_12, %c0_13], %18 {strides = array<i32>} : memref<1x3x2x16x32xf32, #tpu.memory_space<vmem>>, vector<1x3x1x16x32xf32>,
    %c0_14 = arith.constant 0 : index
    %c1 = arith.constant 1 : index
    %c0_15 = arith.constant 0 : index
    %c0_16 = arith.constant 0 : index
    %19 = vector.load %arg3[%c0_14, %c1, %c0_15, %c0_16] : memref<1x2x32x32xf32, #tpu.memory_space<vmem>>, vector<1x1x32x32xf32>
    %20 = vector.shape_cast %19 : vector<1x1x32x32xf32> to vector<32x32xf32>
    %cst_17 = arith.constant dense<0.000000e+00> : vector<48x32xf32>
    %21 = tpu.matmul %11, %20, %cst_17 {dimension_numbers = #tpu.dot_dimension_numbers<[1], [0], [0], [1], [0, 0, 1, 1], [], []>} : vector<48x32xf32>, vector<32x32xf32>, vector<48x32xf32> -> vector<48x32xf32>
    %22 = vector.shape_cast %21 : vector<48x32xf32> to vector<3x16x32xf32>
    %c0_18 = arith.constant 0 : index
    %c0_19 = arith.constant 0 : index
    %c1_20 = arith.constant 1 : index
    %c0_21 = arith.constant 0 : index
    %c0_22 = arith.constant 0 : index
    %23 = vector.load %arg4[%c0_18, %c0_19, %c1_20, %c0_21, %c0_22] : memref<1x3x2x16x32xf32, #tpu.memory_space<vmem>>, vector<1x3x1x16x32xf32>
    %24 = vector.shape_cast %23 : vector<1x3x1x16x32xf32> to vector<3x16x32xf32>
    %25 = vector.shape_cast %22 : vector<3x16x32xf32> to vector<1x3x1x16x32xf32>
    tpu.vector_store %arg4[%c0_18, %c0_19, %c1_20, %c0_21, %c0_22], %25 {strides = array<i32>} : memref<1x3x2x16x32xf32, #tpu.memory_space<vmem>>, vector<1x3x1x16x32xf32>,
    return
  }
  func.func @transform_0(%arg0: i32, %arg1: i32) -> (i32, i32, i32, i32) {
    %c0_i32 = arith.constant 0 : i32
    %c0_i32_0 = arith.constant 0 : i32
    %c0_i32_1 = arith.constant 0 : i32
    return %arg0, %arg1, %c0_i32, %c0_i32_0 : i32, i32, i32, i32
  }
  func.func @transform_1(%arg0: i32, %arg1: i32) -> (i32, i32, i32, i32) {
    %c0_i32 = arith.constant 0 : i32
    %c0_i32_0 = arith.constant 0 : i32
    %c0_i32_1 = arith.constant 0 : i32
    %c0_i32_2 = arith.constant 0 : i32
    return %arg0, %c0_i32, %c0_i32_0, %c0_i32_1 : i32, i32, i32, i32
  }
  func.func @transform_2(%arg0: i32, %arg1: i32) -> (i32, i32, i32, i32, i32) {
    %c0_i32 = arith.constant 0 : i32
    %c0_i32_0 = arith.constant 0 : i32
    %c0_i32_1 = arith.constant 0 : i32
    %c0_i32_2 = arith.constant 0 : i32
    return %arg0, %arg1, %c0_i32, %c0_i32_0, %c0_i32_1 : i32, i32, i32, i32, i32
  }
}

</mosaic_0001>

<bundles_post_ra>
// kernel: tpu_custom_call.1
= control target key start
LH: loop header
LB: loop body
LE: loop exit
PB: predicated region body
PF: predicated region fallthrough
CT: control target
= control target key end

     0   :  { %7 = vsyncpa [#allocation3], 0  ;;  %s1349_s0 = inlined_call_operand.hbm [shape: f32[2,3,16,32], index: 0, kind: input, shape index: {}]   ;;  %s1350_s1 = inlined_call_operand.hbm [shape: f32[2,2,32,32], index: 1, kind: input, shape index: {}]   ;;  %s1351_s2 = inlined_call_operand.hbm [shape: f32[2,3,2,16,32], index: 2, kind: output, shape index: {}]  }
   0x1   :  { %9 = vsyncpa [#allocation3 + $0x1], 0 }
   0x2   :  { %10 = vsyncpa [#allocation6], 0 }
   0x3   :  { %12 = vsyncpa [#allocation6 + $0x1], 0 }
   0x4   :  { %13 = vsyncpa [#allocation4], 0 }
   0x5   :  { %15 = vsyncpa [#allocation4 + $0x1], 0  ;;  %s1047_s9 = smov 0   ;;  %s1049_s10 = smov 0  }
   0x6   :  { %s1051_s11 = smov 0   ;;  %s1053_s12 = smov 0  }
   0x7   :  { %s1055_s13 = smov 0   ;;  %s1057_s14 = smov 0  }
   0x8 LB: > { %s671_s15 = sadd.s32 4294967295, %s1023_s14   ;;  %s672_s16 = sadd.s32 4294967294, %s1023_s14   ;;  %s1023_s14 = sphi %s1057_s14, %s21_s14   ;;  %s1019_s13 = sphi %s1055_s13, %s1369_s13   ;;  %s1015_s12 = sphi %s1053_s12, %s1368_s12   ;;  %s1011_s11 = sphi %s1051_s11, %s1367_s11   ;;  %s1007_s10 = sphi %s1049_s10, %s1366_s10   ;;  %s1003_s9 = sphi %s1047_s9, %s1365_s9  }
   0x9   : > { %s33_s17 = sadd.s32 1, %s1019_s13  ;;  %s42_s18 = sadd.s32 1, %s1011_s11 }
   0xa   : > { %p35_p0 = scmp.ge.s32.totalorder %s33_s17, 2  ;;  %p49_p1 = scmp.ne.s32.totalorder %s1011_s11, %s1007_s10 }
   0xb   : > { %p50_p2 = scmp.eq.s32.totalorder %s1023_s14, 0  ;;  %p55_p3 = scmp.ne.s32.totalorder %s1007_s10, %s1003_s9 }
   0xc   : > { %s1371_s17 = smov (%p35_p0, %s33_s17), 0  ;;  %p56_p5 = scmp.eq.s32.totalorder %s671_s15, 0 }
   0xd   : > { %p1088_p4 = por %p50_p2, %p49_p1  ;;  %s37_s20 = ssub.s32 %s1019_s13, %s1371_s17 }
   0xe   : > { %p107_p6 = scmp.eq.s32.totalorder %s671_s15, 1  ;;  %p40_p7 = scmp.eq.s32.totalorder %s37_s20, 0 }
   0xf   : > { %p1094_p8 = por %p56_p5, %p55_p3  ;;  %p113_p10 = scmp.eq.s32.totalorder %s672_s16, 1 }
  0x10   : > { %p1098_p9 = por %p107_p6, %p49_p1  ;;  %p799_p13 = scmp.lt.s32.totalorder %s1023_s14, 2 }
  0x11   : > { %s1355_s21 = scalar_select %p1094_p8, 1, 0 }
  0x12   : > { %s1356_s22 = scalar_select %p1098_p9, 1, 0 }
  0x13   : > { %s1103_s23 = scalar_select %p40_p7, %s1011_s11, %s42_s18  }
  0x14   : > { %p1105_p11 = por %p113_p10, %p55_p3  ;;  %s1112_s25 = sand.u32 1, %s1011_s11  }
  0x15   : > { %s777_s26 = smul.u32 48, %s1112_s25  ;;  %p1118_p0 = pnand %p799_p13, %p1088_p4 }
  0x16   : > { %s1357_s24 = scalar_select %p1105_p11, 1, 0 }
  0x17   : > { %s778_s27 = smul.u32 768, %s1019_s13  ;;  %s137_s4 = scalar_lea.vmem [#allocation2], %s777_s26 }
  0x18   : > { %s147_s5 = sshll.u32 %s137_s4, 4  ;;  %s134_s6 = scalar_lea.sflag [#allocation3], %s1112_s25  ;;  %s1127_s5 = int_to_ptr.vmem [resolvable:$true] %s147_s5 }
  0x19   : > { %s1125_s3 = scalar_lea.hbm %s1349_s0, %s778_s27  ;;  %p879_p3 = pneg %p1118_p0 }
  0x1a   : > { %s877_s7 = scalar_lea.hbm %s1125_s3, 768  ;;  %s882_s16 = scalar_lea.hbm %s1349_s0, 1536 }
  0x1b   : > { %p878_p2 = scmp.ne.s32.totalorder %s1125_s3, %s877_s7  ;;  %p883_p6 = scmp.lt.u32.totalorder %s1125_s3, %s1349_s0 }
  0x1c   : > { %p884_p7 = scmp.lt.u32.totalorder %s882_s16, %s877_s7  ;;  %p886_p13 = scmp.lt.u32.totalorder %s877_s7, %s1125_s3 }
  0x1d   : > { %p880_p4 = pnand %p879_p3, %p878_p2 }
  0x1e   : > { %p885_p10 = por %p884_p7, %p883_p6 }
  0x1f   : > { %p881_p5 = pneg %p880_p4 }
  0x20   : > { %p887_p12 = por %p886_p13, %p885_p10 }
  0x22   : > { %p888_p1 = pnand %p887_p12, %p881_p5 }
  0x24   : > { %891 = shalt.err (!%p888_p1)
}
  0x25   : > { %s892_s20 = scalar_lea.vmem %s1127_s5, 768  ;;  %s1025_s26 = smov [#allocation2]  }
  0x26   : > { %p893_p2 = scmp.ne.s32.totalorder %s1127_s5, %s892_s20  ;;  %s897_s27 = sshll.u32 %s1025_s26, 4  ;;  %s898_s27 = int_to_ptr.vmem [resolvable:$false] %s897_s27 }
  0x27   : > { %s899_s29 = scalar_lea.vmem %s898_s27, 1536  ;;  %p900_p9 = scmp.lt.s32.totalorder %s1127_s5, %s898_s27 }
  0x28   : > { %p895_p4 = pnand %p893_p2, %p879_p3  ;;  %p901_p6 = scmp.lt.s32.totalorder %s899_s29, %s892_s20 }
  0x2a   : > { %p896_p11 = pneg %p895_p4  ;;  %p902_p7 = por %p901_p6, %p900_p9 }
  0x2c   : > { %p903_p10 = pnand %p902_p7, %p896_p11 }
  0x2e   : > { %906 = shalt.err (!%p903_p10)
}
  0x2f   : > { %s1026_s30 = smov 128   ;;  %s1027_s4 = smov 8  }
  0x30   : > { %791 = dma.hbm_to_vmem [thread:$0]  (!%p1118_p0), %s1125_s3, 768, %s1127_s5, %s134_s6, %s1026_s30, %s1026_s30, %s1027_s4  }
  0x31   : > { %p176_p9 = scmp.lt.s32.totalorder %s1023_s14, 3  ;;  %s676_s7 = sshll.u32 %s1112_s25, 6 }
  0x32   : > { %s706_s8 = sshll.u32 %s1019_s13, 10  ;;  %p1359_p11 = scmp.ge.s32.totalorder %s1023_s14, 1 }
  0x33   : > { %s1173_s19 = scalar_lea.hbm %s1350_s1, %s706_s8  ;;  %s161_s20 = scalar_lea.vmem [#allocation5], %s676_s7 }
  0x34   : > { %p1166_p12 = pnand %p1359_p11, %p176_p9  ;;  %s168_s26 = sshll.u32 %s161_s20, 4  ;;  %s1175_s26 = int_to_ptr.vmem [resolvable:$true] %s168_s26 }
  0x35   : > { %s158_s3 = scalar_lea.sflag [#allocation6], %s1112_s25  ;;  %s907_s5 = scalar_lea.hbm %s1173_s19, 1024 }
  0x36   : > { %p908_p1 = scmp.ne.s32.totalorder %s1173_s19, %s907_s5  ;;  %s912_s29 = scalar_lea.hbm %s1350_s1, 2048 }
  0x37   : > { %p913_p2 = scmp.lt.u32.totalorder %s1173_s19, %s1350_s1  ;;  %p914_p4 = scmp.lt.u32.totalorder %s912_s29, %s907_s5 }
  0x38   : > { %p910_p5 = pnand %p908_p1, %p879_p3  ;;  %p916_p7 = scmp.lt.u32.totalorder %s907_s5, %s1173_s19 }
  0x39   : > { %p915_p6 = por %p914_p4, %p913_p2 }
  0x3a   : > { %p911_p13 = pneg %p910_p5 }
  0x3b   : > { %p917_p10 = por %p916_p7, %p915_p6 }
  0x3d   : > { %p918_p9 = pnand %p917_p10, %p911_p13 }
  0x3f   : > { %921 = shalt.err (!%p918_p9)
}
  0x40   : > { %s922_s7 = scalar_lea.vmem %s1175_s26, 1024  ;;  %s1028_s18 = smov [#allocation5]  }
  0x41   : > { %p923_p11 = scmp.ne.s32.totalorder %s1175_s26, %s922_s7  ;;  %s927_s20 = sshll.u32 %s1028_s18, 4  ;;  %s928_s20 = int_to_ptr.vmem [resolvable:$false] %s927_s20 }
  0x42   : > { %s929_s6 = scalar_lea.vmem %s928_s20, 2048  ;;  %p930_p8 = scmp.lt.s32.totalorder %s1175_s26, %s928_s20 }
  0x43   : > { %p925_p1 = pnand %p923_p11, %p879_p3  ;;  %p931_p2 = scmp.lt.s32.totalorder %s929_s6, %s922_s7 }
  0x45   : > { %p926_p5 = pneg %p925_p1  ;;  %p932_p4 = por %p931_p2, %p930_p8 }
  0x47   : > { %p933_p6 = pnand %p932_p4, %p926_p5 }
  0x49   : > { %936 = shalt.err (!%p933_p6)
}
  0x4a   : > { %794 = dma.hbm_to_vmem [thread:$0]  (!%p1118_p0), %s1173_s19, 1024, %s1175_s26, %s158_s3, %s1026_s30, %s1026_s30, %s1027_s4  }
  0x4b   : > { %180 = sbr.rel (%p1166_p12) target bundleno = 503 (0x1f7), region = 28  ;;  %s1209_s5 = sand.u32 (!%p1166_p12), 1, %s1007_s10  }
  0x4c   : > { %s779_s27 = smul.u32 (!%p1166_p12), 48, %s1209_s5  ;;  %s183_s29 = scalar_lea.sflag (!%p1166_p12), [#allocation3], %s1209_s5 }
  0x4d   : > { %p1361_p8 = scmp.ne.s32.totalorder (!%p1166_p12), %s1355_s21, 0 }
  0x4e   : > { %s186_s28 = scalar_lea.vmem (!%p1166_p12), [#allocation2], %s779_s27 }
  0x52   : > { %990 = dma.done.wait (%p1361_p8), %s183_s29, 768  }
  0x53   : > { %992 = vsyncadd (%p1361_p8), %s183_s29, 4294966528  ;;  %s680_s25 = sshll.u32 %s1209_s5, 6  ;;  %s192_s30 = scalar_lea.sflag [#allocation6], %s1209_s5 }
  0x54   : > { %s1219_s4 = scalar_lea.vmem [#allocation5], %s680_s25 }
  0x55   : > { %994 = dma.done.wait (%p1361_p8), %s192_s30, 1024  }
  0x56   : > { %996 = vsyncadd (%p1361_p8), %s192_s30, 4294966272  ;;  %v1225_v0 = vld [vmem:[%s186_s28 + $0x10] sm:$0xff]  ;;  %vm235_vm0 = vcmask 261120   ;;  %v1227_v1 = vld [vmem:[%s186_s28] sm:$0xff]  ;;  %s780_s21 = smul.u32 96, %s1209_s5  ;;  %p1362_p3 = scmp.ne.s32.totalorder %s1356_s22, 0 }
  0x57   : > { %v1229_v2 = vld [vmem:[%s186_s28 + $0x18] sm:$0xff]  ;;  %v231_v3 = vmul.f32 %v1225_v0, %v1225_v0  ;;  %v229_v4 = vmul.f32 %v1227_v1, %v1227_v1  ;;  %v1237_v6 = vld [vmem:[%s186_s28 + $0x8] sm:$0xff]  ;;  %v1243_v9 = vld [vmem:[%s186_s28 + $0x20] sm:$0xff]  ;;  %s781_s19 = smul.u32 1536, %s1015_s12  ;;  %s545_s12 = scalar_lea.sflag [#allocation4], %s1209_s5 }
  0x58   : > { %v232_v5 = vmul.f32 %v1229_v2, %v1229_v2  ;;  %v230_v7 = vmul.f32 %v1237_v6, %v1237_v6  ;;  %v1241_v8 = vld [vmem:[%s186_s28 + $0x28] sm:$0xff]  ;;  %v233_v15 = vmul.f32 %v1243_v9, %v1243_v9  ;;  %v314_v18 = vld [vmem:[%s1219_s4] sm:$0xff]  ;;  %v316_v24 = vld [vmem:[%s1219_s4 + $0x10] sm:$0xff]  ;;  %s220_s15 = scalar_lea.vmem [#allocation7], %s780_s21  ;;  %s1029_s18 = smov [#allocation7]  }
  0x59   : > { %v242_v10 = vsel %vm235_vm0, %v231_v3, 0.0  ;;  %v236_v11 = vsel %vm235_vm0, %v229_v4, 0.0  ;;  %v234_v14 = vmul.f32 %v1241_v8, %v1241_v8  ;;  %v315_v19 = vld [vmem:[%s1219_s4 + $0x8] sm:$0xff]  ;;  %v687_v20 = vld [vmem:[%s1219_s4 + $0x20] sm:$0xff]  ;;  %v317_v25 = vld [vmem:[%s1219_s4 + $0x18] sm:$0xff]  ;;  %s561_s26 = sshll.u32 %s220_s15, 4  ;;  %s1294_s16 = scalar_lea.hbm %s1351_s2, %s781_s19  ;;  %s1296_s26 = int_to_ptr.vmem [resolvable:$true] %s561_s26 }
  0x5a   : > { %243 = vadd.xlane.f32.xlu1 %v242_v10  ;;  %237 = vadd.xlane.f32.xlu0 %v236_v11  ;;  %v245_v12 = vsel %vm235_vm0, %v232_v5, 0.0  ;;  %v239_v13 = vsel %vm235_vm0, %v230_v7, 0.0  ;;  %v248_v17 = vsel %vm235_vm0, %v233_v15, 0.0  ;;  %v761_v21 = vpack.c.bf16 %v315_v19, %v314_v18  ;;  %v688_v22 = vld [vmem:[%s1219_s4 + $0x28] sm:$0xff]  ;;  %v689_v27 = vld [vmem:[%s1219_s4 + $0x30] sm:$0xff]  ;;  %v690_v28 = vld [vmem:[%s1219_s4 + $0x38] sm:$0xff] }
  0x5b   : > { %v251_v16 = vsel %vm235_vm0, %v234_v14, 0.0  ;;  %v769_v23 = vpack.c.bf16 %v688_v22, %v687_v20  ;;  %v765_v26 = vpack.c.bf16 %v317_v25, %v316_v24  ;;  %v773_v29 = vpack.c.bf16 %v690_v28, %v689_v27  ;;  %s937_s7 = scalar_lea.vmem %s1296_s26, 1536  ;;  %s941_s20 = sshll.u32 %s1029_s18, 4  ;;  %s942_s20 = int_to_ptr.vmem [resolvable:$false] %s941_s20 }
  0x5c   : > { %762 = vmatprep.subr.bf16.mxu0 %v761_v21  ;;  %p938_p0 = scmp.ne.s32.totalorder %s1296_s26, %s937_s7  ;;  %s943_s6 = scalar_lea.vmem %s942_s20, 3072 }
  0x5d   : > { %770 = vmatprep.subr.bf16.mxu1 %v769_v23  ;;  %764 = vmatpush3.bf16.msra.mxu0 %v761_v21  ;;  %p944_p7 = scmp.lt.s32.totalorder %s1296_s26, %s942_s20  ;;  %p945_p10 = scmp.lt.s32.totalorder %s943_s6, %s937_s7 }
  0x5e   : > { %246 = vadd.xlane.f32.xlu1 %v245_v12  ;;  %240 = vadd.xlane.f32.xlu0 %v239_v13  ;;  %p939_p12 = pnand %p938_p0, %p1362_p3 }
  0x5f   : > { %772 = vmatpush3.bf16.msra.mxu1 %v769_v23  ;;  %766 = vmatprep.subr.bf16.mxu0 %v765_v26  ;;  %p946_p9 = por %p945_p10, %p944_p7 }
  0x60   : > { %774 = vmatprep.subr.bf16.mxu1 %v773_v29  ;;  %p940_p13 = pneg %p939_p12 }
  0x61   : > { %768 = vmatpush3.bf16.msra.mxu0 %v765_v26 }
  0x62   : > { %252 = vadd.xlane.f32.xlu1 %v251_v16  ;;  %249 = vadd.xlane.f32.xlu0 %v248_v17  ;;  %p947_p11 = pnand %p946_p9, %p940_p13 }
  0x63   : > { %776 = vmatpush3.bf16.msra.mxu1 %v773_v29 }
  0xe7   : > { %v244_v30 = vpop.xlane.xlu1 %243  ;;  %v238_v31 = vpop.xlane.xlu0 %237 }
  0xe8   : > { %853 = vrsqrt.f32 %v244_v30  ;;  %vm270_vm1 = vcmp.eq.f32.partialorder %v244_v30, inf  ;;  %v273_v39 = vand.u32 2147483648, %v244_v30  ;;  %vm272_vm2 = vcmp.eq.f32.partialorder %v244_v30, 0.0 }
  0xe9   : > { %855 = vrsqrt.f32 %v238_v31  ;;  %vm256_vm3 = vcmp.eq.f32.partialorder %v238_v31, inf  ;;  %v259_v42 = vand.u32 2147483648, %v238_v31  ;;  %vm258_vm4 = vcmp.eq.f32.partialorder %v238_v31, 0.0 }
  0xeb   : > { %v247_v32 = vpop.xlane.xlu1 %246  ;;  %v241_v33 = vpop.xlane.xlu0 %240 }
  0xec   : > { %857 = vrsqrt.f32 %v247_v32  ;;  %vm277_vm5 = vcmp.eq.f32.partialorder %v247_v32, inf  ;;  %vm279_vm6 = vcmp.eq.f32.partialorder %v247_v32, 0.0  ;;  %v280_v49 = vand.u32 2147483648, %v247_v32 }
  0xed   : > { %859 = vrsqrt.f32 %v241_v33  ;;  %vm263_vm7 = vcmp.eq.f32.partialorder %v241_v33, inf  ;;  %v266_v54 = vand.u32 2147483648, %v241_v33  ;;  %vm265_vm8 = vcmp.eq.f32.partialorder %v241_v33, 0.0 }
  0xef   : > { %v253_v34 = vpop.xlane.xlu1 %252  ;;  %v250_v35 = vpop.xlane.xlu0 %249 }
  0xf0   : > { %861 = vrsqrt.f32 %v253_v34  ;;  %vm291_vm9 = vcmp.eq.f32.partialorder %v253_v34, inf  ;;  %vm293_vm10 = vcmp.eq.f32.partialorder %v253_v34, 0.0  ;;  %v294_v63 = vand.u32 2147483648, %v253_v34 }
  0xf1   : > { %863 = vrsqrt.f32 %v250_v35  ;;  %vm284_vm11 = vcmp.eq.f32.partialorder %v250_v35, inf  ;;  %v287_v5 = vand.u32 2147483648, %v250_v35  ;;  %vm286_vm12 = vcmp.eq.f32.partialorder %v250_v35, 0.0 }
  0xf2   : > { %v854_v36 = vpop.eup %853 }
  0xf3   : > { %v856_v37 = vpop.eup %855  ;;  %v269_v38 = vmul.f32 %v854_v36, %v244_v30 }
  0xf4   : > { %v255_v40 = vmul.f32 %v856_v37, %v238_v31 }
  0xf5   : > { %v271_v41 = vsel %vm270_vm1, %v244_v30, %v269_v38 }
  0xf6   : > { %v858_v43 = vpop.eup %857  ;;  %v274_v44 = vsel %vm272_vm2, %v273_v39, %v271_v41  ;;  %v257_v45 = vsel %vm256_vm3, %v238_v31, %v255_v40 }
  0xf7   : > { %v860_v46 = vpop.eup %859  ;;  %v276_v47 = vmul.f32 %v858_v43, %v247_v32  ;;  %v260_v48 = vsel %vm258_vm4, %v259_v42, %v257_v45  ;;  %v298_v52 = vadd.f32 1e-16, %v274_v44 }
  0xf8   : > { %v262_v50 = vmul.f32 %v860_v46, %v241_v33  ;;  %v296_v51 = vadd.f32 1e-16, %v260_v48 }
  0xf9   : > { %v278_v53 = vsel %vm277_vm5, %v247_v32, %v276_v47 }
  0xfa   : > { %v862_v55 = vpop.eup %861  ;;  %v281_v56 = vsel %vm279_vm6, %v280_v49, %v278_v53  ;;  %v264_v57 = vsel %vm263_vm7, %v241_v33, %v262_v50  ;;  %865 = vrcp.f32 %v296_v51 }
  0xfb   : > { %v864_v58 = vpop.eup %863  ;;  %v267_v59 = vsel %vm265_vm8, %v266_v54, %v264_v57  ;;  %v290_v60 = vmul.f32 %v862_v55, %v253_v34  ;;  %v299_v61 = vadd.f32 1e-16, %v281_v56  ;;  %867 = vrcp.f32 %v298_v52 }
  0xfc   : > { %v297_v62 = vadd.f32 1e-16, %v267_v59  ;;  %v283_v3 = vmul.f32 %v864_v58, %v250_v35 }
  0xfd   : > { %v292_v4 = vsel %vm291_vm9, %v253_v34, %v290_v60 }
  0xfe   : > { %869 = vrcp.f32 %v297_v62  ;;  %v295_v7 = vsel %vm293_vm10, %v294_v63, %v292_v4  ;;  %v285_v10 = vsel %vm284_vm11, %v250_v35, %v283_v3 }
  0xff   : > { %v288_v11 = vsel %vm286_vm12, %v287_v5, %v285_v10  ;;  %871 = vrcp.f32 %v299_v61  ;;  %v301_v12 = vadd.f32 1e-16, %v295_v7 }
 0x100   : > { %v300_v13 = vadd.f32 1e-16, %v288_v11 }
 0x102   : > { %873 = vrcp.f32 %v300_v13 }
 0x103   : > { %875 = vrcp.f32 %v301_v12 }
 0x104   : > { %v866_v14 = vpop.eup %865 }
 0x105   : > { %v308_v15 = vmul.f32 %v866_v14, %v1227_v1  ;;  %v868_v16 = vpop.eup %867 }
 0x106   : > { %v310_v20 = vmul.f32 %v868_v16, %v1225_v0 }
 0x107   : > { %735 = vmatprep.mubr.msk.f32.mxu0 %vm235_vm0, %v308_v15  ;;  %752 = vmatprep.mubr.msk.f32.mxu1 %vm235_vm0, %v308_v15 }
 0x108   : > { %v870_v17 = vpop.eup %869 }
 0x109   : > { %v309_v18 = vmul.f32 %v870_v17, %v1237_v6  ;;  %v872_v19 = vpop.eup %871 }
 0x10a   : > { %v311_v1 = vmul.f32 %v872_v19, %v1229_v2 }
 0x10b   : > { %736 = vmatmul.mubr.msk.f32.vlgmr.msra.gmra.mrb[0].mxu0 %vm235_vm0, %v309_v18  ;;  %753 = vmatmul.mubr.msk.f32.vlgmr.msra.gmra.mrb[0].mxu1 %vm235_vm0, %v309_v18 }
 0x10c   : > { %v874_v21 = vpop.eup %873  ;;  %738 = vmatprep.mubr.msk.f32.mxu0 %vm235_vm0, %v310_v20  ;;  %755 = vmatprep.mubr.msk.f32.mxu1 %vm235_vm0, %v310_v20 }
 0x10d   : > { %v312_v22 = vmul.f32 %v874_v21, %v1243_v9  ;;  %v876_v23 = vpop.eup %875 }
 0x10e   : > { %v313_v0 = vmul.f32 %v876_v23, %v1241_v8 }
 0x10f   : > { %739 = vmatmul.mubr.msk.f32.gmra.mrb[2].mxu0 %vm235_vm0, %v311_v1  ;;  %756 = vmatmul.mubr.msk.f32.gmra.mrb[2].mxu1 %vm235_vm0, %v311_v1 }
 0x110   : > { %741 = vmatprep.mubr.msk.f32.mxu0 %vm235_vm0, %v312_v22  ;;  %758 = vmatprep.mubr.msk.f32.mxu1 %vm235_vm0, %v312_v22 }
 0x113   : > { %742 = vmatmul.mubr.msk.f32.gmra.mrb[4].mxu0 %vm235_vm0, %v313_v0  ;;  %759 = vmatmul.mubr.msk.f32.gmra.mrb[4].mxu1 %vm235_vm0, %v313_v0 }
 0x1de   : > { %v737_v2 = vpop.f32.mrb[0].mxu0  ;;  %v754_v6 = vpop.f32.mrb[0].mxu1 }
 0x1df   : > { %432 = vst.msk [vmem:[%s220_s15 + $0x8] sm:$0xff] %vm235_vm0, %v737_v2  ;;  %698 = vst.msk [vmem:[%s220_s15 + $0x18] sm:$0xff] %vm235_vm0, %v754_v6  ;;  %v402_v9 = vpop.f32.mrb[1].mxu0  ;;  %v508_v24 = vpop.f32.mrb[1].mxu1 }
 0x1e0   : > { %431 = vst.msk [vmem:[%s220_s15] sm:$0xff] %vm235_vm0, %v402_v9  ;;  %697 = vst.msk [vmem:[%s220_s15 + $0x10] sm:$0xff] %vm235_vm0, %v508_v24 }
 0x1e2   : > { %v740_v8 = vpop.f32.mrb[2].mxu0  ;;  %v757_v25 = vpop.f32.mrb[2].mxu1 }
 0x1e3   : > { %434 = vst.msk [vmem:[%s220_s15 + $0x28] sm:$0xff] %vm235_vm0, %v740_v8  ;;  %700 = vst.msk [vmem:[%s220_s15 + $0x38] sm:$0xff] %vm235_vm0, %v757_v25  ;;  %v412_v26 = vpop.f32.mrb[3].mxu0  ;;  %v518_v27 = vpop.f32.mrb[3].mxu1 }
 0x1e4   : > { %433 = vst.msk [vmem:[%s220_s15 + $0x20] sm:$0xff] %vm235_vm0, %v412_v26  ;;  %699 = vst.msk [vmem:[%s220_s15 + $0x30] sm:$0xff] %vm235_vm0, %v518_v27 }
 0x1e6   : > { %v743_v28 = vpop.f32.mrb[4].mxu0  ;;  %v760_v29 = vpop.f32.mrb[4].mxu1 }
 0x1e7   : > { %436 = vst.msk [vmem:[%s220_s15 + $0x48] sm:$0xff] %vm235_vm0, %v743_v28  ;;  %702 = vst.msk [vmem:[%s220_s15 + $0x58] sm:$0xff] %vm235_vm0, %v760_v29  ;;  %v422_v30 = vpop.f32.mrb[5].mxu0  ;;  %v528_v31 = vpop.f32.mrb[5].mxu1 }
 0x1e8   : > { %435 = vst.msk [vmem:[%s220_s15 + $0x40] sm:$0xff] %vm235_vm0, %v422_v30  ;;  %701 = vst.msk [vmem:[%s220_s15 + $0x50] sm:$0xff] %vm235_vm0, %v528_v31 }
 0x1e9   : > { %950 = shalt.err (!%p947_p11)
}
 0x1ea   : > { %s951_s27 = scalar_lea.hbm %s1294_s16, 1536  ;;  %s955_s25 = scalar_lea.hbm %s1351_s2, 3072 }
 0x1eb   : > { %p952_p1 = scmp.ne.s32.totalorder %s1294_s16, %s951_s27  ;;  %p956_p4 = scmp.lt.u32.totalorder %s1294_s16, %s1351_s2 }
 0x1ec   : > { %p957_p6 = scmp.lt.u32.totalorder %s955_s25, %s951_s27  ;;  %p959_p0 = scmp.lt.u32.totalorder %s951_s27, %s1294_s16 }
 0x1ed   : > { %p953_p5 = pnand %p952_p1, %p1362_p3 }
 0x1ee   : > { %p958_p8 = por %p957_p6, %p956_p4 }
 0x1ef   : > { %p954_p2 = pneg %p953_p5 }
 0x1f0   : > { %p960_p12 = por %p959_p0, %p958_p8 }
 0x1f2   : > { %p961_p13 = pnand %p960_p12, %p954_p2 }
 0x1f4   : > { %964 = shalt.err (!%p961_p13)
}
 0x1f5   : > { %s1030_s21 = smov 128   ;;  %s1031_s15 = smov 8  }
 0x1f6   : > { %786 = dma.vmem_to_hbm [thread:$0]  (%p1362_p3), %s1296_s26, 1536, %s1294_s16, %s545_s12, %s1030_s21, %s1030_s21, %s1031_s15  }
 0x1f7 PF: > { %s576_s19 = sand.u32 1, %s1003_s9   ;;  %p1363_p7 = scmp.ne.s32.totalorder %s1357_s24, 0 }
 0x1f8   : > { %p1364_p10 = scmp.ge.s32.totalorder %s1023_s14, 2  ;;  %s577_s3 = scalar_lea.sflag [#allocation4], %s576_s19 }
 0x1fa   : > { %p796_p9 = pnand %p1364_p10, %p1363_p7 }
 0x1fc   : > { %998 = dma.done.wait (!%p796_p9), %s577_s3, 1536  }
 0x1fd   : > { %1000 = vsyncadd (!%p796_p9), %s577_s3, 4294965760  ;;  %s21_s14 = sadd.s32 1, %s1023_s14   ;;  %s1365_s9 = smov %s1007_s10 }
 0x1fe   : > { %p18_p11 = scmp.ge.s32.totalorder %s21_s14, 4   ;;  %s1366_s10 = smov %s1011_s11 }
 0x1ff   : > { %s1367_s11 = smov %s1103_s23  ;;  %s1368_s12 = smov %s1019_s13 }
 0x200   : > { %s1369_s13 = smov %s1371_s17  ;;  %20 = sbr.rel (!%p18_p11) target bundleno = 8 (0x8), region = 88 }
 0x207   :  { %582 = vsyncpa [#allocation3], 1 }
 0x208   :  { %584 = vsyncpa [#allocation3 + $0x1], 1 }
 0x209   :  { %585 = vsyncpa [#allocation6], 1 }
 0x20a   :  { %587 = vsyncpa [#allocation6 + $0x1], 1 }
 0x20b   :  { %588 = vsyncpa [#allocation4], 1 }
 0x20c   :  { %590 = vsyncpa [#allocation4 + $0x1], 1 }

</bundles_post_ra>
